<compile_context>
chip_gen: v7x
topology: tpu7x:2x2x1
jax: 0.10.0
libtpu: 0.0.40
codegen_flags: <defaults>
</compile_context>

<pallas_src>
from collections import Counter

import numpy as np
import jax
import jax.numpy as jnp
from jax import lax
from jax.experimental import pallas as pl
from jax.experimental.pallas import tpu as pltpu

# ----------------------------------------------------------------------------
# Problem configuration (matches index ranges referenced by seg_based_rule).
# ----------------------------------------------------------------------------
IN_CHANNELS = 1
SEG_CONCEPT_NUM = 14                     # argmax labels 0..13 referenced by rules
GLOBAL_INDEX = [list(range(22, 27))]     # 5 "binary" concepts -> columns 22..26
LOCAL_INDEX = [list(range(0, 22))]       # 22 "quality" concepts -> columns 0..21
NUM_CONCEPTS = 27
NUM_LOCAL = len(LOCAL_INDEX[0])          # 22
NUM_GLOBAL = len(GLOBAL_INDEX[0])        # 5

HID = 128                                # stand-in backbone hidden width (lane-dense)
NC_PAD = 128                             # lane-padded concept width
K_IMG = 9                                # image-channel 3x3 taps
K_ASSIGN = SEG_CONCEPT_NUM * 9           # assign-channel 3x3 taps (126)
K_FEAT = K_IMG + K_ASSIGN                # 135 im2col columns
K_PAD = 144                              # padded to multiple of 16 (bf16 sublanes)
NCOLS = HID * (1 + NUM_LOCAL)            # 2944 = global hidden + 22 local hiddens

RELATIONSHIP = {
    0: (5,), 1: (5,), 2: (5,), 3: (5,), 4: (4,),
    5: (6,), 6: (8,), 7: (9,), 8: (7,), 9: (7,), 10: (7,), 11: (7,), 12: (7,),
    13: (6, 7), 14: (10,), 15: (12,), 16: (11,),
    17: (13,), 18: (13,), 19: (13,), 20: (13,), 21: (13,),
}


# ----------------------------------------------------------------------------
# im2col (computed ONCE per forward, shared by global + all 22 local paths)
# ----------------------------------------------------------------------------
def im2col3x3(x):
    """x: (B, C, H, W) NCHW -> patches (B, H*W, C*9), 'same' zero padding.
    Column ordering is (channel, tap) flattened as c*9 + t."""
    B, C, H, W = x.shape
    xp = jnp.pad(x, ((0, 0), (0, 0), (1, 1), (1, 1)))
    cols = []
    for i in range(3):
        for j in range(3):
            cols.append(xp[:, :, i:i + H, j:j + W])
    p = jnp.stack(cols, axis=2)                # (B, C, 9, H, W)
    p = p.reshape(B, C * 9, H * W)
    return jnp.transpose(p, (0, 2, 1))         # (B, HW, C*9)


def _pick_tile(hw):
    """Largest spatial tile (multiple of 8) that divides HW, capped for VMEM."""
    for cand in (2048, 1024, 512, 256, 128, 64, 32, 16, 8):
        if hw % cand == 0:
            return cand
    return hw


# ----------------------------------------------------------------------------
# Pallas kernel 1: fused concept backbone (global + 22 local conceivers)
# ----------------------------------------------------------------------------
def concept_kernel(xp_ref, w_all_ref, b_all_ref, w_fc_ref, b_out_ref,
                   out_ref, acc_ref):
    # xp_ref:    (1, thw, K_PAD)   bf16   im2col patches of [image; assign]
    # w_all_ref: (K_PAD, NCOLS)    bf16   fused conv weights (global + 22 local)
    # b_all_ref: (1, NCOLS)        f32    fused conv bias
    # w_fc_ref:  (NCOLS, NC_PAD)   f32    fused FC (each concept reads its block)
    # b_out_ref: (1, NC_PAD)       f32    combined FC bias
    # out_ref:   (1, 1, NC_PAD)    f32    concept logits (lanes 0..26)
    # acc_ref:   (1, NCOLS)        f32    GAP accumulator (VMEM scratch)
    t = pl.program_id(1)

    @pl.when(t == 0)
    def _():
        acc_ref[...] = jnp.zeros_like(acc_ref)

    x = xp_ref[0]                                              # (thw, K_PAD) bf16
    h = (jnp.dot(x, w_all_ref[...], preferred_element_type=jnp.float32)
         + b_all_ref[...])                                     # (thw, NCOLS) f32
    h = jnp.maximum(h, 0.0)                                    # ReLU
    acc_ref[...] += jnp.sum(h, axis=0, keepdims=True)          # partial GAP sum

    @pl.when(t == pl.num_programs(1) - 1)
    def _():
        hw_total = pl.num_programs(1) * x.shape[0]
        p = acc_ref[...] * (1.0 / jnp.float32(hw_total))       # global-avg-pool
        out_ref[0] = (jnp.dot(p, w_fc_ref[...],
                              preferred_element_type=jnp.float32)
                      + b_out_ref[...])                        # lane-dense store


def concept_forward(params, image, assign_mtx):
    """All conceivers in one pallas_call. Returns concept logits (B, 27)."""
    B, _, H, W = image.shape
    HW = H * W

    x_cat = jnp.concatenate([image, assign_mtx], axis=1)       # (B, 1+C_SEG, H, W)
    patches = im2col3x3(x_cat)                                  # (B, HW, K_FEAT)
    patches = jnp.pad(patches, ((0, 0), (0, 0), (0, K_PAD - K_FEAT)))
    patches = patches.astype(jnp.bfloat16)                      # (B, HW, K_PAD)

    thw = _pick_tile(HW)
    n_t = HW // thw

    def const_spec(arr):
        nd = arr.ndim
        return pl.BlockSpec(arr.shape, lambda b, t, _n=nd: (0,) * _n)

    out = pl.pallas_call(
        concept_kernel,
        out_shape=jax.ShapeDtypeStruct((B, 1, NC_PAD), jnp.float32),
        grid=(B, n_t),
        in_specs=[
            pl.BlockSpec((1, thw, K_PAD), lambda b, t: (b, t, 0)),
            const_spec(params["w_all"]),
            const_spec(params["b_all"]),
            const_spec(params["w_fc"]),
            const_spec(params["b_out"]),
        ],
        out_specs=pl.BlockSpec((1, 1, NC_PAD), lambda b, t: (b, 0, 0)),
        scratch_shapes=[pltpu.VMEM((1, NCOLS), jnp.float32)],
        compiler_params=pltpu.CompilerParams(
            dimension_semantics=("parallel", "arbitrary")),
    )(patches, params["w_all"], params["b_all"], params["w_fc"], params["b_out"])
    return out[:, 0, :NUM_CONCEPTS]                             # (B, 27)


# ----------------------------------------------------------------------------
# Pallas kernel 2: segmentation statistics (argmax labels + label presence)
# ----------------------------------------------------------------------------
def seg_stats_kernel(a_ref, lab_ref, pres_ref):
    a = a_ref[0]                                             # (C, HW) f32
    C, HW = a.shape
    iota = lax.broadcasted_iota(jnp.int32, (C, HW), 0)
    m = jnp.max(a, axis=0, keepdims=True)                    # (1, HW)
    labels = jnp.min(jnp.where(a >= m, iota, C), axis=0, keepdims=True)  # first-max
    lab_ref[0] = labels.astype(jnp.int32)                    # (1, HW)
    eq = (labels == iota).astype(jnp.float32)                # (C, HW)
    pres_ref[0] = (jnp.sum(eq, axis=1, keepdims=True) > 0.0).astype(jnp.float32)


def seg_stats(assign_mtx):
    """assign_mtx (B, C, H, W) -> labels (B, H*W) int32, presence (B, C) f32."""
    B, C, H, W = assign_mtx.shape
    HW = H * W
    a = assign_mtx.reshape(B, C, HW)
    labels, presence = pl.pallas_call(
        seg_stats_kernel,
        out_shape=(
            jax.ShapeDtypeStruct((B, 1, HW), jnp.int32),
            jax.ShapeDtypeStruct((B, C, 1), jnp.float32),
        ),
        grid=(B,),
        in_specs=[pl.BlockSpec((1, C, HW), lambda b: (b, 0, 0))],
        out_specs=(
            pl.BlockSpec((1, 1, HW), lambda b: (b, 0, 0)),
            pl.BlockSpec((1, C, 1), lambda b: (b, 0, 0)),
        ),
        compiler_params=pltpu.CompilerParams(dimension_semantics=("parallel",)),
    )(a)
    return labels[:, 0, :], presence[:, :, 0]


# ----------------------------------------------------------------------------
# seg_based_rule: tiny (B, 27) arithmetic -> plain XLA (no kernel launch)
# ----------------------------------------------------------------------------
def build_rule_constants_np():
    req = np.zeros((SEG_CONCEPT_NUM, NUM_CONCEPTS), np.float32)
    req[1, 25] = 1; req[3, 25] = 1
    req[1, 26] = 1; req[2, 26] = 1
    req[4, 23] = 1
    req[5, [0, 1, 2, 3]] = 1
    req[6, 5] = 1
    req[8, 6] = 1
    req[9, 7] = 1
    req[7, [8, 9, 10, 11, 12]] = 1
    req[10, 14] = 1
    req[11, 16] = 1
    req[12, 15] = 1
    req[13, [17, 18, 19, 20, 21]] = 1

    qvec = np.zeros((1, NUM_CONCEPTS), np.float32)
    qvec[0, np.array(sum(LOCAL_INDEX, []))] = 1.0
    bvec = np.zeros((1, NUM_CONCEPTS), np.float32)
    bvec[0, np.array(GLOBAL_INDEX[0])] = 1.0
    return req, qvec, bvec


_REQ_NP, _QVEC_NP, _BVEC_NP = build_rule_constants_np()


def seg_based_rule(concept, presence, plane_rows):
    req = jnp.asarray(_REQ_NP)
    qvec = jnp.asarray(_QVEC_NP)
    bvec = jnp.asarray(_BVEC_NP)

    # zero concept j for batch b if any required seg label is absent
    viol = jnp.dot(1.0 - presence, req)                        # (B, NC)
    mask = plane_rows * (viol < 0.5).astype(jnp.float32)

    # quality concepts: relu then 10 - relu(10 - x) == clip(x, 0, 10)
    cc = jnp.where(qvec > 0.5, jnp.clip(concept, 0.0, 10.0), concept)

    logit = mask * cc
    pred = jnp.where(bvec > 0.5,
                     (jax.nn.sigmoid(logit) >= 0.5).astype(jnp.float32),
                     logit) * mask
    return logit, mask, pred


# ----------------------------------------------------------------------------
# Host-side plane heuristic (host python in the PyTorch reference too).
# ----------------------------------------------------------------------------
def plane_mask_row(p):
    m = np.ones(NUM_CONCEPTS, np.float32)
    if p == 2:
        m[22:] = 0; m[:13] = 0
    elif p == 1:
        m[:4] = 0; m[13:] = 0
    elif p == 3:
        m[:22] = 0
    elif p == 0:
        m[4:] = 0
    return m                                   # p == -1 -> no plane masking


def compute_plane(labels_1d):
    counts = Counter(labels_1d)
    counts = list(sorted(list(counts.keys()), key=lambda x: counts[x], reverse=True))
    if len(counts) >= 3:
        counts = counts[1:4]
    else:
        counts = counts[1:]
    if (10 in counts) + (12 in counts) + (13 in counts) + (11 in counts) >= 2:
        return 2
    elif (6 in counts) + (7 in counts) + (8 in counts) + (9 in counts) >= 2:
        return 1
    elif (1 in counts) + (2 in counts) + (3 in counts) >= 2:
        return 3
    elif 5 in counts:
        return 0
    elif len(counts) > 0 and counts[0] in [10, 11, 12, 13]:
        return 2
    elif len(counts) > 0 and counts[0] in [6, 7, 8, 9]:
        return 1
    elif len(counts) > 0 and counts[0] in [1, 2, 3, 4]:
        return 3
    # TODO(synk): PyTorch reference appends nothing here (misaligned plane list);
    # we use "no plane masking" instead.
    return -1


# ----------------------------------------------------------------------------
# Parameter init (deterministic, synthetic) + fused weight packing.
# ----------------------------------------------------------------------------
def init_params(key):
    ks = jax.random.split(key, 10)

    def rnd(k, shape):
        return np.asarray(0.1 * jax.random.normal(k, shape, jnp.float32))

    # global conceiver (stand-in): conv over [image; 14 assign channels]
    wg_img = rnd(ks[0], (K_IMG, HID))
    wg_assign = rnd(ks[1], (K_ASSIGN, HID))
    bg = rnd(ks[2], (1, HID))
    wfg = rnd(ks[3], (HID, NUM_GLOBAL))
    bfg = rnd(ks[4], (NUM_GLOBAL,))
    # local conceiver (stand-in): conv over [image; summed seg mask], shared by 22 concepts
    wl_img = rnd(ks[5], (K_IMG, HID))
    wl_seg = rnd(ks[6], (K_IMG, HID))
    bl = rnd(ks[7], (1, HID))
    wfl = rnd(ks[8], (HID, NUM_LOCAL))
    bfl = rnd(ks[9], (NUM_LOCAL,))

    # (a) seg-channel selection matrix: which labels feed local concept j
    sel = np.zeros((SEG_CONCEPT_NUM, NUM_LOCAL), np.float32)
    for j, cidx in enumerate(LOCAL_INDEX[0]):
        for c in RELATIONSHIP[cidx]:
            sel[c, j] = 1.0
    # (b) per-concept expanded seg conv weights: conv of the channel-summed mask
    #     == assign-im2col slab @ (selection x shared seg-conv weight)
    wl_seg_big = np.einsum('cj,th->ctjh', sel, wl_seg).reshape(K_ASSIGN, NUM_LOCAL * HID)

    # (c) fused conv weight: columns [0:HID) = global backbone, then 22 local blocks
    w_all = np.zeros((K_PAD, NCOLS), np.float32)
    w_all[0:K_IMG, 0:HID] = wg_img
    w_all[K_IMG:K_FEAT, 0:HID] = wg_assign
    w_all[0:K_IMG, HID:] = np.tile(wl_img, (1, NUM_LOCAL))
    w_all[K_IMG:K_FEAT, HID:] = wl_seg_big

    b_all = np.concatenate([bg, np.tile(bl, (1, NUM_LOCAL))], axis=1)  # (1, NCOLS)

    # (d) fused FC: global block -> concept lanes 22..26, local block j -> lane j
    w_fc = np.zeros((NCOLS, NC_PAD), np.float32)
    for g, col in enumerate(GLOBAL_INDEX[0]):
        w_fc[0:HID, col] = wfg[:, g]
    for j, col in enumerate(LOCAL_INDEX[0]):
        w_fc[HID + j * HID: HID + (j + 1) * HID, col] = wfl[:, j]

    b_out = np.zeros((1, NC_PAD), np.float32)
    b_out[0, np.array(LOCAL_INDEX[0])] = bfl
    b_out[0, np.array(GLOBAL_INDEX[0])] = bfg

    return dict(
        w_all=jnp.asarray(w_all, jnp.bfloat16),
        b_all=jnp.asarray(b_all, jnp.float32),
        w_fc=jnp.asarray(w_fc, jnp.float32),
        b_out=jnp.asarray(b_out, jnp.float32),
    )


# ----------------------------------------------------------------------------
# FetalConceiver forward
# ----------------------------------------------------------------------------
def fetal_conceiver_forward(params, x):
    image = x["image"]            # (B, 1, H, W)
    assign_mtx = x["assign_mtx"]  # (B, C_SEG, H, W)
    B = image.shape[0]

    # 1) seg statistics kernel (argmax labels + per-label presence)
    labels, presence = seg_stats(assign_mtx)                 # (B, HW), (B, C_SEG)

    # TODO(synk): fetal_caliper_concept is not defined in the reference; identity here.

    # 2) dispatch the fused concept kernel BEFORE syncing labels to host so the
    #    device->host round-trip of the plane heuristic overlaps the conv work.
    concept = concept_forward(params, image, assign_mtx)     # (B, 27)

    # 3) host-side plane heuristic (host python in the PyTorch reference too)
    labels_np = np.asarray(labels)
    plane = [compute_plane(labels_np[b]) for b in range(B)]
    plane_rows = jnp.asarray(np.stack([plane_mask_row(p) for p in plane], axis=0))

    # 4) rule step (tiny -> plain XLA)
    concept_logit, concept_mask, concept_pred = seg_based_rule(
        concept, presence, plane_rows)

    out = dict(x)
    out["assign_mtx"] = assign_mtx
    out["concept_logit"] = concept_logit
    out["concept_mask"] = concept_mask
    out["concept_pred"] = concept_pred
    return out


# ----------------------------------------------------------------------------
if __name__ == "__main__":
    B, H, W = 2, 16, 16
    key = jax.random.PRNGKey(0)
    k_img, k_seg, k_par = jax.random.split(key, 3)

    image = jax.random.normal(k_img, (B, IN_CHANNELS, H, W), jnp.float32)
    assign_mtx = jax.nn.softmax(
        jax.random.normal(k_seg, (B, SEG_CONCEPT_NUM, H, W), jnp.float32), axis=1)

    params = init_params(k_par)
    out = fetal_conceiver_forward(params, {"image": image, "assign_mtx": assign_mtx})

    jax.block_until_ready(out["concept_logit"])
    jax.block_until_ready(out["concept_mask"])
    jax.block_until_ready(out["concept_pred"])
    assert out["concept_logit"].shape == (B, NUM_CONCEPTS)
    assert out["concept_mask"].shape == (B, NUM_CONCEPTS)
    assert out["concept_pred"].shape == (B, NUM_CONCEPTS)
    assert bool(jnp.all(jnp.isfinite(out["concept_logit"])))
    print("KERNEL_OK")
</pallas_src>

<mosaic_0001>
module attributes {stable_mosaic.version = 11 : i64} {
  func.func @seg_stats_kernel(%arg0: i32, %arg1: memref<1x14x256xf32, #tpu.memory_space<vmem>>, %arg2: memref<1x1x256xi32, #tpu.memory_space<vmem>>, %arg3: memref<1x14x1xf32, #tpu.memory_space<vmem>>) attributes {dimension_semantics = [#tpu.dimension_semantics<parallel>], iteration_bounds = array<i64: 2>, scalar_prefetch = 0 : i64, scratch_operands = 0 : i64, tpu.core_type = #tpu.core_type<tc>, window_params = [{transform_indices = @transform_0, window_bounds = array<i64: 1, 14, 256>}, {transform_indices = @transform_1, window_bounds = array<i64: 1, 1, 256>}, {transform_indices = @transform_2, window_bounds = array<i64: 1, 14, 1>}]} {
    %c0 = arith.constant 0 : index
    %c0_0 = arith.constant 0 : index
    %c0_1 = arith.constant 0 : index
    %0 = vector.load %arg1[%c0, %c0_0, %c0_1] : memref<1x14x256xf32, #tpu.memory_space<vmem>>, vector<1x14x256xf32>
    %1 = vector.shape_cast %0 : vector<1x14x256xf32> to vector<14x256xf32>
    %2 = tpu.iota {dimensions = array<i32: 0>} : vector<14x256xi32>
    %cst = arith.constant dense<0xFF800000> : vector<256xf32>
    %3 = vector.multi_reduction <maximumf>, %1, %cst [0] : vector<14x256xf32> to vector<256xf32>
    %4 = vector.shape_cast %3 : vector<256xf32> to vector<1x256xf32>
    %5 = vector.broadcast %4 : vector<1x256xf32> to vector<14x256xf32>
    %6 = arith.cmpf oge, %1, %5 : vector<14x256xf32>
    %c14_i32 = arith.constant 14 : i32
    %7 = vector.broadcast %c14_i32 : i32 to vector<14x256xi32>
    %8 = arith.select %6, %2, %7 : vector<14x256xi1>, vector<14x256xi32>
    %cst_2 = arith.constant dense<2147483647> : vector<256xi32>
    %9 = vector.multi_reduction <minsi>, %8, %cst_2 [0] : vector<14x256xi32> to vector<256xi32>
    %10 = vector.shape_cast %9 : vector<256xi32> to vector<1x256xi32>
    %c0_3 = arith.constant 0 : index
    %c0_4 = arith.constant 0 : index
    %c0_5 = arith.constant 0 : index
    %11 = vector.load %arg2[%c0_3, %c0_4, %c0_5] : memref<1x1x256xi32, #tpu.memory_space<vmem>>, vector<1x1x256xi32>
    %12 = vector.shape_cast %11 : vector<1x1x256xi32> to vector<1x256xi32>
    %13 = vector.shape_cast %10 : vector<1x256xi32> to vector<1x1x256xi32>
    tpu.vector_store %arg2[%c0_3, %c0_4, %c0_5], %13 {strides = array<i32>} : memref<1x1x256xi32, #tpu.memory_space<vmem>>, vector<1x1x256xi32>,
    %14 = vector.broadcast %10 : vector<1x256xi32> to vector<14x256xi32>
    %15 = arith.cmpi eq, %14, %2 : vector<14x256xi32>
    %16 = arith.extui %15 : vector<14x256xi1> to vector<14x256xi32>
    %17 = arith.sitofp %16 : vector<14x256xi32> to vector<14x256xf32>
    %cst_6 = arith.constant dense<0.000000e+00> : vector<14xf32>
    %18 = vector.multi_reduction <add>, %17, %cst_6 [1] : vector<14x256xf32> to vector<14xf32>
    %19 = vector.shape_cast %18 : vector<14xf32> to vector<14x1xf32>
    %cst_7 = arith.constant 0.000000e+00 : f32
    %20 = vector.broadcast %cst_7 : f32 to vector<14x1xf32>
    %21 = arith.cmpf ogt, %19, %20 : vector<14x1xf32>
    %22 = arith.extui %21 : vector<14x1xi1> to vector<14x1xi32>
    %23 = arith.sitofp %22 : vector<14x1xi32> to vector<14x1xf32>
    %c0_8 = arith.constant 0 : index
    %c0_9 = arith.constant 0 : index
    %c0_10 = arith.constant 0 : index
    %24 = vector.load %arg3[%c0_8, %c0_9, %c0_10] : memref<1x14x1xf32, #tpu.memory_space<vmem>>, vector<1x14x1xf32>
    %25 = vector.shape_cast %24 : vector<1x14x1xf32> to vector<14x1xf32>
    %26 = vector.shape_cast %23 : vector<14x1xf32> to vector<1x14x1xf32>
    tpu.vector_store %arg3[%c0_8, %c0_9, %c0_10], %26 {strides = array<i32>} : memref<1x14x1xf32, #tpu.memory_space<vmem>>, vector<1x14x1xf32>,
    return
  }
  func.func @transform_0(%arg0: i32) -> (i32, i32, i32) {
    %c0_i32 = arith.constant 0 : i32
    %c0_i32_0 = arith.constant 0 : i32
    %c0_i32_1 = arith.constant 0 : i32
    return %arg0, %c0_i32, %c0_i32_0 : i32, i32, i32
  }
  func.func @transform_1(%arg0: i32) -> (i32, i32, i32) {
    %c0_i32 = arith.constant 0 : i32
    %c0_i32_0 = arith.constant 0 : i32
    %c0_i32_1 = arith.constant 0 : i32
    return %arg0, %c0_i32, %c0_i32_0 : i32, i32, i32
  }
  func.func @transform_2(%arg0: i32) -> (i32, i32, i32) {
    %c0_i32 = arith.constant 0 : i32
    %c0_i32_0 = arith.constant 0 : i32
    %c0_i32_1 = arith.constant 0 : i32
    return %arg0, %c0_i32, %c0_i32_0 : i32, i32, i32
  }
}

</mosaic_0001>

<bundles_post_ra>
// kernel: tpu_custom_call.1
= control target key start
LH: loop header
LB: loop body
LE: loop exit
PB: predicated region body
PF: predicated region fallthrough
CT: control target
= control target key end

     0   :  { %8 = vsyncpa [#allocation3], 0  ;;  %s629_s0 = inlined_call_operand.vmem [shape: f32[2,14,256], index: 0, kind: input, shape index: {}]   ;;  %s630_s1 = inlined_call_operand.hbm [shape: s32[2,1,256], index: 1, kind: output, shape index: {0}]   ;;  %s631_s2 = inlined_call_operand.vmem [shape: f32[2,14,1], index: 2, kind: output, shape index: {1}]  }
   0x1   :  { %10 = vsyncpa [#allocation3 + $0x1], 0  ;;  %s514_s9 = smov 0   ;;  %s516_s10 = smov 0  }
   0x2   :  { %s518_s11 = smov 0   ;;  %s520_s12 = smov 0  }
   0x3 LB: > { %s535_s13 = sadd.s32 4294967295, %s494_s12   ;;  %s368_s14 = sadd.s32 4294967294, %s494_s12   ;;  %s494_s12 = sphi %s520_s12, %s637_s12   ;;  %s490_s11 = sphi %s518_s11, %s636_s11   ;;  %s486_s10 = sphi %s516_s10, %s635_s10   ;;  %s482_s9 = sphi %s514_s9, %s634_s9  }
   0x4   : > { %s539_s15 = sadd.s32 1, %s494_s12   ;;  %s49_s16 = sadd.s32 1, %s490_s11 }
   0x5   : > { %s46_s17 = ssub.s32 %s494_s12, %s539_s15  ;;  %p59_p0 = scmp.ne.s32.totalorder %s490_s11, %s486_s10 }
   0x6   : > { %p47_p1 = scmp.eq.s32.totalorder %s46_s17, 0  ;;  %p60_p2 = scmp.eq.s32.totalorder %s535_s13, 1 }
   0x7   : > { %p65_p3 = scmp.ne.s32.totalorder %s486_s10, %s482_s9  ;;  %p66_p4 = scmp.eq.s32.totalorder %s368_s14, 1 }
   0x8   : > { %s550_s18 = scalar_select %p47_p1, %s490_s11, %s49_s16  }
   0x9   : > { %p552_p5 = por %p60_p2, %p59_p0  ;;  %p556_p6 = por %p66_p4, %p65_p3 }
   0xa   : > { %p371_p7 = scmp.ge.s32.totalorder %s494_s12, 1  ;;  %p118_p8 = scmp.lt.s32.totalorder %s494_s12, 3 }
   0xc   : > { %p119_p9 = pnand %p371_p7, %p118_p8 }
   0xd   : > { %p145_p10 = scmp.lt.s32.totalorder (!%p119_p9), %s535_s13, 1  ;;  %vm162_vm0 = vcmask (!%p119_p9), 1045504   ;;  %v159_v9 = vlaneseq (!%p119_p9)  ;;  %v496_v43 = vmov (!%p119_p9), 0.0   ;;  %v497_v52 = vmov (!%p119_p9), 1966171168   ;;  %s135_s26 = sand.u32 (!%p119_p9), 1, %s486_s10  }
   0xe   : > { %122 = sbr.rel (%p119_p9) target bundleno = 212 (0xd4), region = 24  ;;  %v213_v53 = vunpack.c.l.s4 (!%p119_p9), %v497_v52  ;;  %s372_s27 = sshll.u32 (!%p119_p9), %s135_s26, 1 }
   0xf   : > { %v160_v14 = vshrl.u32 (!%p119_p9), %v159_v9, 7  ;;  %s390_s28 = sshll.u32 (!%p119_p9), %s535_s13, 5  ;;  %s137_s29 = scalar_lea.vmem (!%p119_p9), [#allocation2], %s372_s27 }
  0x10   : > { %v214_v54 = vunpack.c.0.s8 (!%p119_p9), %v213_v53  ;;  %s281_s30 = sshll.u32 (!%p119_p9), %s137_s29, 4  ;;  %s587_s5 = scalar_lea.hbm (!%p119_p9), %s630_s1, %s390_s28  ;;  %s282_s30 = int_to_ptr.vmem [resolvable:$true] %s281_s30 }
  0x11   : > { %v161_v19 = vadd.s32 (!%p119_p9), 8, %v160_v14  ;;  %s262_s6 = scalar_lea.sflag (!%p119_p9), [#allocation3], %s135_s26  ;;  %s432_s7 = scalar_lea.vmem (!%p119_p9), %s282_s30, 32 }
  0x12   : > { %v217_v55 = vsub.s32 (!%p119_p9), %v214_v54, %v160_v14  ;;  %p433_p11 = scmp.ne.s32.totalorder (!%p119_p9), %s282_s30, %s432_s7  ;;  %s498_s8 = smov (!%p119_p9), [#allocation2]  }
  0x13   : > { %s436_s14 = sshll.u32 (!%p119_p9), %s498_s8, 4  ;;  %s437_s14 = int_to_ptr.vmem [resolvable:$false] %s436_s14 }
  0x14   : > { %p434_p12 = pnand (!%p119_p9), %p433_p11, %p552_p5  ;;  %s438_s16 = scalar_lea.vmem (!%p119_p9), %s437_s14, 64 }
  0x15   : > { %s564_s21 = scalar_select %p145_p10, %s535_s13, 1 }
  0x16   : > { %p435_p13 = pneg %p434_p12  ;;  %p439_p0 = scmp.lt.s32.totalorder %s282_s30, %s437_s14 }
  0x17   : > { %s388_s22 = sshll.u32 %s564_s21, 5  ;;  %p440_p1 = scmp.lt.s32.totalorder %s438_s16, %s432_s7 }
  0x18   : > { %s149_s25 = scalar_lea.vmem %s629_s0, %s388_s22 }
  0x19   : > { %v155_v0 = vld [vmem:[%s149_s25] sm:$0xff]  ;;  %v156_v1 = vld [vmem:[%s149_s25 + $0x8] sm:$0xff]  ;;  %v157_v2 = vld [vmem:[%s149_s25 + $0x10] sm:$0x3f]  ;;  %p441_p2 = por %p440_p1, %p439_p0 }
  0x1a   : > { %v158_v3 = vld [vmem:[%s149_s25 + $0x18] sm:$0x3f]  ;;  %v163_v4 = vsel %vm162_vm0, %v157_v2, -inf }
  0x1b   : > { %v164_v5 = vmax.f32 %v155_v0, %v163_v4  ;;  %v171_v6 = vsel %vm162_vm0, %v158_v3, -inf  ;;  %p442_p3 = pnand %p441_p2, %p435_p13 }
  0x1c   : > { %v172_v7 = vmax.f32 %v156_v1, %v171_v6 }
  0x1d   : > { %v165_v8 = vrot.slane %v164_v5, 4 }
  0x1e   : > { %v173_v10 = vrot.slane %v172_v7, 4 }
  0x1f   : > { %v166_v11 = vmax.f32 %v164_v5, %v165_v8 }
  0x20   : > { %v174_v12 = vmax.f32 %v172_v7, %v173_v10 }
  0x21   : > { %v167_v13 = vrot.slane %v166_v11, 2 }
  0x22   : > { %v175_v15 = vrot.slane %v174_v12, 2 }
  0x23   : > { %v168_v16 = vmax.f32 %v166_v11, %v167_v13 }
  0x24   : > { %v176_v17 = vmax.f32 %v174_v12, %v175_v15 }
  0x25   : > { %v169_v18 = vrot.slane %v168_v16, 1 }
  0x26   : > { %v177_v20 = vrot.slane %v176_v17, 1 }
  0x27   : > { %v170_v21 = vmax.f32 %v168_v16, %v169_v18 }
  0x28   : > { %v178_v22 = vmax.f32 %v176_v17, %v177_v20 }
  0x29   : > { %vm179_vm1 = vcmp.ge.f32.partialorder %v155_v0, %v170_v21  ;;  %vm181_vm2 = vcmp.ge.f32.partialorder %v157_v2, %v170_v21 }
  0x2a   : > { %vm180_vm3 = vcmp.ge.f32.partialorder %v156_v1, %v178_v22  ;;  %vm182_vm4 = vcmp.ge.f32.partialorder %v158_v3, %v178_v22  ;;  %v183_v23 = vsel %vm179_vm1, %v160_v14, 14  ;;  %v185_v24 = vsel %vm181_vm2, %v161_v19, 14 }
  0x2b   : > { %v184_v25 = vsel %vm180_vm3, %v160_v14, 14  ;;  %v186_v26 = vsel %vm182_vm4, %v161_v19, 14  ;;  %v187_v27 = vsel %vm162_vm0, %v185_v24, 2147483647  ;;  %vm228_vm2 = vcmp.lt.s32.totalorder %v159_v9, 256 }
  0x2c   : > { %vm188_vm5 = vcmp.lt.s32.totalorder %v183_v23, %v187_v27  ;;  %v199_v28 = vsel %vm162_vm0, %v186_v26, 2147483647 }
  0x2d   : > { %v189_v29 = vsel %vm188_vm5, %v183_v23, %v187_v27  ;;  %vm200_vm6 = vcmp.lt.s32.totalorder %v184_v25, %v199_v28 }
  0x2e   : > { %v190_v30 = vrot.slane %v189_v29, 4  ;;  %v201_v31 = vsel %vm200_vm6, %v184_v25, %v199_v28 }
  0x2f   : > { %v202_v32 = vrot.slane %v201_v31, 4 }
  0x30   : > { %vm191_vm7 = vcmp.lt.s32.totalorder %v189_v29, %v190_v30 }
  0x31   : > { %v192_v33 = vsel %vm191_vm7, %v189_v29, %v190_v30  ;;  %vm203_vm8 = vcmp.lt.s32.totalorder %v201_v31, %v202_v32 }
  0x32   : > { %v193_v34 = vrot.slane %v192_v33, 2  ;;  %v204_v35 = vsel %vm203_vm8, %v201_v31, %v202_v32 }
  0x33   : > { %v205_v36 = vrot.slane %v204_v35, 2 }
  0x34   : > { %vm194_vm9 = vcmp.lt.s32.totalorder %v192_v33, %v193_v34 }
  0x35   : > { %v195_v37 = vsel %vm194_vm9, %v192_v33, %v193_v34  ;;  %vm206_vm10 = vcmp.lt.s32.totalorder %v204_v35, %v205_v36 }
  0x36   : > { %v196_v38 = vrot.slane %v195_v37, 1  ;;  %v207_v39 = vsel %vm206_vm10, %v204_v35, %v205_v36 }
  0x37   : > { %v208_v40 = vrot.slane %v207_v39, 1 }
  0x38   : > { %vm197_vm11 = vcmp.lt.s32.totalorder %v195_v37, %v196_v38 }
  0x39   : > { %v198_v41 = vsel %vm197_vm11, %v195_v37, %v196_v38  ;;  %vm209_vm12 = vcmp.lt.s32.totalorder %v207_v39, %v208_v40 }
  0x3a   : > { %v210_v42 = vsel %vm209_vm12, %v207_v39, %v208_v40  ;;  %vm231_vm13 = vcmp.eq.s32.totalorder %v198_v41, %v160_v14  ;;  %vm233_vm14 = vcmp.eq.s32.totalorder %v198_v41, %v161_v19 }
  0x3b   : > { %vm232_vm15 = vcmp.eq.s32.totalorder %v210_v42, %v160_v14  ;;  %v377_v44 = vsel %vm231_vm13, 1.0, %v496_v43  ;;  %vm234_vm1 = vcmp.eq.s32.totalorder %v210_v42, %v161_v19  ;;  %v379_v46 = vsel %vm233_vm14, 1.0, %v496_v43 }
  0x3c   : > { %v378_v45 = vsel %vm232_vm15, 1.0, %v496_v43  ;;  %v380_v47 = vsel %vm234_vm1, 1.0, %v496_v43  ;;  %v246_v49 = vsel %vm162_vm0, %v379_v46, 0.0  ;;  %v211_v56 = vcombine.low %v198_v41, %v210_v42 }
  0x3d   : > { %v243_v48 = vadd.f32 %v378_v45, %v377_v44  ;;  %v247_v50 = vsel %vm162_vm0, %v380_v47, 0.0 }
  0x3e   : > { %v248_v51 = vadd.f32 %v247_v50, %v246_v49  ;;  %v218_v57 = vrot.slane %v211_v56, %v217_v55 }
  0x3f   : > { %244 = vadd.xlane.f32.xlu0 %v243_v48 }
  0x40   : > { %v225_v58 = vrot.slane %v218_v57, %v217_v55 }
  0x42   : > { %230 = vst.msk [vmem:[%s137_s29] sm:$0x3] %vm228_vm2, %v225_v58 }
  0x43   : > { %249 = vadd.xlane.f32.xlu0 %v248_v51 }
  0x44   : > { %445 = shalt.err (!%p442_p3)
}
  0x45   : > { %s446_s13 = scalar_lea.hbm %s587_s5, 32  ;;  %s450_s23 = scalar_lea.hbm %s630_s1, 64 }
  0x46   : > { %p447_p4 = scmp.ne.s32.totalorder %s587_s5, %s446_s13  ;;  %p451_p9 = scmp.lt.u32.totalorder %s587_s5, %s630_s1 }
  0x47   : > { %p452_p10 = scmp.lt.u32.totalorder %s450_s23, %s446_s13  ;;  %p454_p12 = scmp.lt.u32.totalorder %s446_s13, %s587_s5 }
  0x48   : > { %p448_p7 = pnand %p447_p4, %p552_p5 }
  0x49   : > { %p453_p11 = por %p452_p10, %p451_p9 }
  0x4a   : > { %p449_p8 = pneg %p448_p7 }
  0x4b   : > { %p455_p13 = por %p454_p12, %p453_p11 }
  0x4d   : > { %p456_p0 = pnand %p455_p13, %p449_p8 }
  0x4f   : > { %459 = shalt.err (!%p456_p0)
}
  0x50   : > { %391 = dma.vmem_to_hbm [thread:$0]  (%p552_p5), %s282_s30, 32, %s587_s5, %s262_s6   ;;  %vm257_vm0 = vcmask 7168   ;;  %vm259_vm4 = vcmask 5120  }
  0x51   : > { %s389_s26 = sshll.u32 %s564_s21, 4 }
  0x52   : > { %s154_s29 = scalar_lea.vmem %s631_s2, %s389_s26 }
  0xcc   : > { %v245_v59 = vpop.xlane.xlu0 %244 }
  0xcd   : > { %vm251_vm3 = vcmp.gt.f32.partialorder %v245_v59, 0.0 }
  0xce   : > { %v381_v60 = vsel %vm251_vm3, 1.0, %v496_v43 }
  0xcf   : > { %258 = vst.msk [vmem:[%s154_s29] sm:$0xff] %vm257_vm0, %v381_v60 }
  0xd0   : > { %v250_v61 = vpop.xlane.xlu0 %249 }
  0xd1   : > { %vm252_vm5 = vcmp.gt.f32.partialorder %v250_v61, 0.0 }
  0xd2   : > { %v382_v62 = vsel %vm252_vm5, 1.0, %v496_v43 }
  0xd3   : > { %260 = vst.msk [vmem:[%s154_s29 + $0x8] sm:$0x3f] %vm259_vm4, %v382_v62 }
  0xd4 PF: > { %p397_p5 = scmp.ge.s32.totalorder %s494_s12, 2  ;;  %s296_s19 = sand.u32 1, %s482_s9  }
  0xd5   : > { %s297_s21 = scalar_lea.sflag [#allocation3], %s296_s19 }
  0xd6   : > { %p394_p1 = pnand %p397_p5, %p556_p6 }
  0xd8   : > { %477 = dma.done.wait (!%p394_p1), %s297_s21, 32  }
  0xd9   : > { %479 = vsyncadd (!%p394_p1), %s297_s21, 4294967264  ;;  %p13_p2 = scmp.ge.s32.totalorder %s539_s15, 4   ;;  %s634_s9 = smov %s486_s10 }
  0xda   : > { %s635_s10 = smov %s490_s11  ;;  %s636_s11 = smov %s550_s18 }
  0xdb   : > { %s637_s12 = smov %s539_s15  ;;  %15 = sbr.rel (!%p13_p2) target bundleno = 3 (0x3), region = 71 }
  0xe2   :  { %310 = vsyncpa [#allocation3], 1 }
  0xe3   :  { %312 = vsyncpa [#allocation3 + $0x1], 1 }

</bundles_post_ra>
